<compile_context>
chip_gen: v6e
topology: v6e:2x2x1
jax: 0.10.0
libtpu: 0.0.40
codegen_flags: <defaults>
</compile_context>

<pallas_src>
import math

import jax
import jax.numpy as jnp
from jax.experimental import pallas as pl
from jax.experimental.pallas import tpu as pltpu


# ----------------------------------------------------------------------------
# Sinusoidal timestep-embedding table (pure JAX glue, built once at init time,
# mirroring the PyTorch get_timestep_embedding on torch.arange(num_timesteps)).
# ----------------------------------------------------------------------------
def get_timestep_embedding(timesteps, embedding_dim):
    assert timesteps.ndim == 1
    half_dim = embedding_dim // 2
    emb = math.log(10000.0) / (half_dim - 1)
    emb = jnp.exp(jnp.arange(half_dim, dtype=jnp.float32) * -emb)
    emb = timesteps.astype(jnp.float32)[:, None] * emb[None, :]
    emb = jnp.concatenate([jnp.sin(emb), jnp.cos(emb)], axis=1)
    if embedding_dim % 2 == 1:
        emb = jnp.pad(emb, ((0, 0), (0, 1)))
    return emb


# ----------------------------------------------------------------------------
# Kernel factories.  Both compute, for a (tb, L) batch block:
#   h  = relu(x @ W_in + b_in)
#   h  = relu(concat([h, temb]) @ W_i + b_i)   for i in range(num_hidden)
#   o  = h @ W_out + b_out
# ----------------------------------------------------------------------------
def make_latent_mlp_kernel_concat(num_hidden, embedding_dim):
    """v6e / v7x form: one K=2E matmul per hidden layer using a persistent
    (tb, 2E) bf16 scratch whose upper E lanes hold temb (written once)."""
    E = embedding_dim

    def kernel(x_ref, temb_ref, w_in_ref, b_in_ref, *rest):
        w_full_refs = rest[:num_hidden]
        b_all_ref, w_out_ref, b_out_ref, o_ref, hcat = rest[num_hidden:]

        # Cast x to the matmul compute dtype in-kernel (saves a wrapper-side
        # astype that would re-stream x through HBM).
        x = x_ref[...].astype(w_in_ref.dtype)          # (tb, L)   bf16

        # Stage temb once into the upper E lanes of the (tb, 2E) buffer.
        hcat[:, E:] = temb_ref[...]                     # bf16

        # fc_in + ReLU (bias / ReLU in f32 — v5e VPU has no bf16 math, and it
        # is equally safe on v6e/v7x).
        h = (jnp.dot(x, w_in_ref[...], preferred_element_type=jnp.float32)
             + b_in_ref[...])
        h = jnp.maximum(h, 0.0)

        # Hidden layers: single K=2E matmul per layer (256-deep MXU => same
        # cadence as K=E; one fewer MXU launch per layer, no f32 t_proj live).
        for i in range(num_hidden):
            hcat[:, :E] = h.astype(hcat.dtype)
            h = (jnp.dot(hcat[...], w_full_refs[i][...],
                         preferred_element_type=jnp.float32)
                 + b_all_ref[:, i * E:(i + 1) * E])
            h = jnp.maximum(h, 0.0)

        # fc_out (no activation)
        o_ref[...] = (jnp.dot(h.astype(w_out_ref.dtype), w_out_ref[...],
                              preferred_element_type=jnp.float32)
                      + b_out_ref[...]).astype(o_ref.dtype)

    return kernel


def make_latent_mlp_kernel_split(num_hidden, embedding_dim):
    """v5e form (128-deep MXU): per-layer K=E matmul on the critical path with
    the temb contributions fused into one off-chain (E, num_hidden*E) matmul."""
    E = embedding_dim

    def kernel(x_ref, temb_ref, w_in_ref, b_in_ref, *rest):
        wa_refs = rest[:num_hidden]
        wb_all_ref, b_all_ref, w_out_ref, b_out_ref, o_ref = rest[num_hidden:]

        x = x_ref[...].astype(w_in_ref.dtype)           # (tb, L)  bf16
        temb = temb_ref[...]                            # (tb, E)  bf16

        # Fused timestep projection for ALL hidden layers (+ biases), off the
        # serial h-chain so it overlaps with fc_in on the MXU.
        t_proj = (jnp.dot(temb, wb_all_ref[...],
                          preferred_element_type=jnp.float32)
                  + b_all_ref[...])                     # (tb, nh*E) f32

        h = (jnp.dot(x, w_in_ref[...], preferred_element_type=jnp.float32)
             + b_in_ref[...])
        h = jnp.maximum(h, 0.0)

        for i in range(num_hidden):
            h = (jnp.dot(h.astype(wa_refs[i].dtype), wa_refs[i][...],
                         preferred_element_type=jnp.float32)
                 + t_proj[:, i * E:(i + 1) * E])
            h = jnp.maximum(h, 0.0)

        o_ref[...] = (jnp.dot(h.astype(w_out_ref.dtype), w_out_ref[...],
                              preferred_element_type=jnp.float32)
                      + b_out_ref[...]).astype(o_ref.dtype)

    return kernel


# ----------------------------------------------------------------------------
# Tile / mode selection helpers.
# ----------------------------------------------------------------------------
def _default_hidden_mode():
    """'split' on v5* (128-deep MXU), 'concat' on v6e / v7x (256-deep MXU)."""
    try:
        kind = jax.devices()[0].device_kind.lower()
    except Exception:
        return "concat"
    return "split" if "v5" in kind else "concat"


def _choose_batch_tile(B, max_tb=512):
    """Batch tile: multiple of 16 (bf16 sublane packing), MXU-M aligned when
    large, and >=2 blocks whenever B allows so the 'parallel' batch axis feeds
    both v7x TensorCores (a no-op on single-TC v5e/v6e)."""
    if B <= 32:
        return B                       # tiny batch: one full-extent block
    tb = min(max_tb, ((B + 1) // 2 + 15) // 16 * 16)
    for align in (256, 128):
        if tb >= align:
            tb = max(align, (tb // align) * align)
            break
    return tb


# ----------------------------------------------------------------------------
# Wrapper: flatten, gather timestep embeddings, run the batch-blocked kernel,
# unflatten.  No wrapper-side padding: Pallas masks the ragged edge block.
# ----------------------------------------------------------------------------
def latent_mlp_forward(x, timesteps, packed, temb_table, *,
                       num_hidden=3, mode=None, max_block_b=512,
                       compute_dtype=jnp.bfloat16, out_dtype=jnp.float32):
    if mode is None:
        mode = _default_hidden_mode()

    B = x.shape[0]
    in_shape = tuple(x.shape[1:])
    L = int(math.prod(in_shape))
    E = temb_table.shape[1]
    nE = num_hidden * E

    tb = _choose_batch_tile(B, max_block_b)
    grid = (pl.cdiv(B, tb),)

    # Flatten (layout no-op); keep native dtype — cast to bf16 happens in-kernel.
    x_flat = x.reshape(B, L)

    # Per-sample timestep-embedding gather (tiny table; wrapper glue).
    # TODO(synk): fold this gather into the kernel via scalar-prefetched
    # timesteps + an in-kernel row lookup to save one small HBM round trip.
    temb_sel = jnp.take(temb_table, timesteps, axis=0).astype(compute_dtype)

    def full(shape):   # whole-array block, resident (constant index) across grid
        return pl.BlockSpec(shape, lambda b: (0,) * len(shape))

    if mode == "concat":
        kernel = make_latent_mlp_kernel_concat(num_hidden, E)
        args = (x_flat, temb_sel,
                packed["w_in"], packed["b_in"],
                *[packed[f"wfull{i}"] for i in range(num_hidden)],
                packed["b_all"], packed["w_out"], packed["b_out"])
        in_specs = [
            pl.BlockSpec((tb, L), lambda b: (b, 0)),       # x batch block (f32)
            pl.BlockSpec((tb, E), lambda b: (b, 0)),       # temb batch block
            full((L, E)), full((1, E)),                    # fc_in
            *[full((2 * E, E)) for _ in range(num_hidden)],  # full hidden W_i
            full((1, nE)),                                 # hidden biases
            full((E, L)), full((1, L)),                    # fc_out
        ]
        scratch_shapes = [pltpu.VMEM((tb, 2 * E), compute_dtype)]
    else:  # "split" (v5e)
        kernel = make_latent_mlp_kernel_split(num_hidden, E)
        args = (x_flat, temb_sel,
                packed["w_in"], packed["b_in"],
                *[packed[f"wa{i}"] for i in range(num_hidden)],
                packed["wb_all"], packed["b_all"],
                packed["w_out"], packed["b_out"])
        in_specs = [
            pl.BlockSpec((tb, L), lambda b: (b, 0)),       # x batch block (f32)
            pl.BlockSpec((tb, E), lambda b: (b, 0)),       # temb batch block
            full((L, E)), full((1, E)),                    # fc_in
            *[full((E, E)) for _ in range(num_hidden)],    # hidden W_top
            full((E, nE)), full((1, nE)),                  # fused temb proj + biases
            full((E, L)), full((1, L)),                    # fc_out
        ]
        scratch_shapes = []

    # VMEM budget derived from the actual plan: double-buffered streaming
    # blocks + (possibly double-buffered) resident weights + concat scratch
    # + f32 activation headroom + 2 MiB slack.
    bpe_x = jnp.dtype(x_flat.dtype).itemsize
    bpe_c = jnp.dtype(compute_dtype).itemsize
    bpe_o = jnp.dtype(out_dtype).itemsize
    stream = 2 * (tb * L * bpe_x + tb * E * bpe_c + tb * L * bpe_o)
    weights = 2 * ((L * E + E * L + num_hidden * 2 * E * E) * bpe_c
                   + (E + L + nE) * 4)
    scratch_b = tb * 2 * E * bpe_c if mode == "concat" else 0
    act = 4 * tb * max(L, 2 * E, nE) * 4
    vmem_bytes = int(min(max(stream + weights + scratch_b + act + (2 << 20),
                             8 << 20), 64 << 20))

    out_flat = pl.pallas_call(
        kernel,
        out_shape=jax.ShapeDtypeStruct((B, L), out_dtype),
        grid=grid,
        in_specs=in_specs,
        out_specs=pl.BlockSpec((tb, L), lambda b: (b, 0)),
        scratch_shapes=scratch_shapes,
        compiler_params=pltpu.CompilerParams(
            dimension_semantics=("parallel",),   # shard batch blocks across TCs (v7x)
            vmem_limit_bytes=vmem_bytes),
    )(*args)

    return out_flat.reshape((B,) + in_shape)


# ----------------------------------------------------------------------------
# Deterministic parameter initialization (PyTorch Linear-style uniform bounds).
# Weights stored as (in_features, out_features) so the kernel does x @ W.
# Hidden weights W_i (2E, E): the top E rows multiply h, the bottom E rows
# multiply the timestep embedding (matches torch.cat((x1, temb), dim=1) @ W).
# ----------------------------------------------------------------------------
def init_params(key, in_length, embedding_dim, num_hidden=3):
    E = embedding_dim

    def linear(key, fan_in, fan_out):
        kw, kb = jax.random.split(key)
        bound = 1.0 / math.sqrt(fan_in)
        w = jax.random.uniform(kw, (fan_in, fan_out), jnp.float32, -bound, bound)
        b = jax.random.uniform(kb, (1, fan_out), jnp.float32, -bound, bound)
        return w, b

    keys = jax.random.split(key, 2 + num_hidden)
    params = {}
    params["w_in"], params["b_in"] = linear(keys[0], in_length, E)
    for i in range(num_hidden):
        w, b = linear(keys[1 + i], 2 * E, E)
        params[f"w{i}a"] = w[:E, :]     # multiplies h
        params[f"w{i}b"] = w[E:, :]     # multiplies timestep embedding
        params[f"b{i}"] = b
    params["w_out"], params["b_out"] = linear(keys[-1], E, in_length)
    return params


# Pack parameters into kernel format for BOTH hidden-layer forms (tiny):
# bf16 matmul weights, f32 biases; split form gets the fused (E, nh*E) temb
# projection, concat form gets per-layer full (2E, E) weights.
def pack_params(params, num_hidden, compute_dtype=jnp.bfloat16):
    packed = {
        "w_in": params["w_in"].astype(compute_dtype),
        "b_in": params["b_in"].astype(jnp.float32),
        "w_out": params["w_out"].astype(compute_dtype),
        "b_out": params["b_out"].astype(jnp.float32),
        "b_all": jnp.concatenate(
            [params[f"b{i}"] for i in range(num_hidden)], axis=1
        ).astype(jnp.float32),
        "wb_all": jnp.concatenate(
            [params[f"w{i}b"] for i in range(num_hidden)], axis=1
        ).astype(compute_dtype),
    }
    for i in range(num_hidden):
        packed[f"wa{i}"] = params[f"w{i}a"].astype(compute_dtype)
        packed[f"wfull{i}"] = jnp.concatenate(
            [params[f"w{i}a"], params[f"w{i}b"]], axis=0
        ).astype(compute_dtype)
    return packed


if __name__ == "__main__":
    # Small, module-consistent shapes.
    B = 2
    in_shape = (4, 16, 16)               # latent NCHW per-sample shape
    L = int(math.prod(in_shape))         # 1024
    embedding_dim = 128
    num_timesteps = 64
    num_hidden = 3

    key = jax.random.PRNGKey(0)
    k_x, k_p = jax.random.split(key)

    x = jax.random.normal(k_x, (B,) + in_shape, dtype=jnp.float32)
    timesteps = jnp.array([3, 17], dtype=jnp.int32)

    params = init_params(k_p, L, embedding_dim, num_hidden)
    packed = pack_params(params, num_hidden)
    temb_table = get_timestep_embedding(jnp.arange(num_timesteps), embedding_dim)

    out = latent_mlp_forward(x, timesteps, packed, temb_table,
                             num_hidden=num_hidden)
    out = jax.block_until_ready(out)

    assert out.shape == (B,) + in_shape
    assert out.dtype == jnp.float32

    # Pure-JAX reference with identical bf16 weight/activation rounding and
    # f32 accumulation (same math as both kernel forms, layer-by-layer).
    def ref_forward(x, timesteps):
        cd = jnp.bfloat16
        xf = x.reshape(B, L).astype(cd)
        t = jnp.take(temb_table, timesteps, axis=0).astype(cd)
        h = (jnp.dot(xf, params["w_in"].astype(cd),
                     preferred_element_type=jnp.float32) + params["b_in"])
        h = jnp.maximum(h, 0.0)
        for i in range(num_hidden):
            h = (jnp.dot(h.astype(cd), params[f"w{i}a"].astype(cd),
                         preferred_element_type=jnp.float32)
                 + jnp.dot(t, params[f"w{i}b"].astype(cd),
                           preferred_element_type=jnp.float32)
                 + params[f"b{i}"])
            h = jnp.maximum(h, 0.0)
        o = (jnp.dot(h.astype(cd), params["w_out"].astype(cd),
                     preferred_element_type=jnp.float32) + params["b_out"])
        return o.reshape((B,) + in_shape)

    ref = ref_forward(x, timesteps)
    max_err = float(jnp.max(jnp.abs(out - ref)))
    assert jnp.allclose(out, ref, atol=2e-3, rtol=2e-3), max_err

    print("KERNEL_OK")
</pallas_src>

<mosaic_0001>
module attributes {stable_mosaic.version = 11 : i64} {
  func.func @kernel(%arg0: i32, %arg1: memref<2x1024xf32, #tpu.memory_space<vmem>>, %arg2: memref<2x128xbf16, #tpu.memory_space<vmem>>, %arg3: memref<1024x128xbf16, #tpu.memory_space<vmem>>, %arg4: memref<1x128xf32, #tpu.memory_space<vmem>>, %arg5: memref<256x128xbf16, #tpu.memory_space<vmem>>, %arg6: memref<256x128xbf16, #tpu.memory_space<vmem>>, %arg7: memref<256x128xbf16, #tpu.memory_space<vmem>>, %arg8: memref<1x384xf32, #tpu.memory_space<vmem>>, %arg9: memref<128x1024xbf16, #tpu.memory_space<vmem>>, %arg10: memref<1x1024xf32, #tpu.memory_space<vmem>>, %arg11: memref<2x1024xf32, #tpu.memory_space<vmem>>, %arg12: memref<2x256xbf16, #tpu.memory_space<vmem>>) attributes {dimension_semantics = [#tpu.dimension_semantics<parallel>], iteration_bounds = array<i64: 1>, scalar_prefetch = 0 : i64, scratch_operands = 1 : i64, tpu.core_type = #tpu.core_type<tc>, window_params = [{transform_indices = @transform_0, window_bounds = array<i64: 2, 1024>}, {transform_indices = @transform_1, window_bounds = array<i64: 2, 128>}, {pipeline_mode = #tpu.pipeline_mode<synchronous>, transform_indices = @transform_2, window_bounds = array<i64: 1024, 128>}, {pipeline_mode = #tpu.pipeline_mode<synchronous>, transform_indices = @transform_3, window_bounds = array<i64: 1, 128>}, {pipeline_mode = #tpu.pipeline_mode<synchronous>, transform_indices = @transform_4, window_bounds = array<i64: 256, 128>}, {pipeline_mode = #tpu.pipeline_mode<synchronous>, transform_indices = @transform_5, window_bounds = array<i64: 256, 128>}, {pipeline_mode = #tpu.pipeline_mode<synchronous>, transform_indices = @transform_6, window_bounds = array<i64: 256, 128>}, {pipeline_mode = #tpu.pipeline_mode<synchronous>, transform_indices = @transform_7, window_bounds = array<i64: 1, 384>}, {pipeline_mode = #tpu.pipeline_mode<synchronous>, transform_indices = @transform_8, window_bounds = array<i64: 128, 1024>}, {pipeline_mode = #tpu.pipeline_mode<synchronous>, transform_indices = @transform_9, window_bounds = array<i64: 1, 1024>}, {transform_indices = @transform_10, window_bounds = array<i64: 2, 1024>}]} {
    %c0 = arith.constant 0 : index
    %c0_0 = arith.constant 0 : index
    %0 = vector.load %arg1[%c0, %c0_0] : memref<2x1024xf32, #tpu.memory_space<vmem>>, vector<2x1024xf32>
    %1 = arith.truncf %0 : vector<2x1024xf32> to vector<2x1024xbf16>
    %c0_1 = arith.constant 0 : index
    %c0_2 = arith.constant 0 : index
    %2 = vector.load %arg2[%c0_1, %c0_2] : memref<2x128xbf16, #tpu.memory_space<vmem>>, vector<2x128xbf16>
    %c0_3 = arith.constant 0 : index
    %c128 = arith.constant 128 : index
    %3 = vector.load %arg12[%c0_3, %c128] : memref<2x256xbf16, #tpu.memory_space<vmem>>, vector<2x128xbf16>
    tpu.vector_store %arg12[%c0_3, %c128], %2 {strides = array<i32>} : memref<2x256xbf16, #tpu.memory_space<vmem>>, vector<2x128xbf16>,
    %c0_4 = arith.constant 0 : index
    %c0_5 = arith.constant 0 : index
    %4 = vector.load %arg3[%c0_4, %c0_5] : memref<1024x128xbf16, #tpu.memory_space<vmem>>, vector<1024x128xbf16>
    %cst = arith.constant dense<0.000000e+00> : vector<2x128xf32>
    %5 = tpu.matmul %1, %4, %cst {dimension_numbers = #tpu.dot_dimension_numbers<[1], [0], [0], [1], [0, 0, 1, 1], [], []>} : vector<2x1024xbf16>, vector<1024x128xbf16>, vector<2x128xf32> -> vector<2x128xf32>
    %c0_6 = arith.constant 0 : index
    %c0_7 = arith.constant 0 : index
    %6 = vector.load %arg4[%c0_6, %c0_7] : memref<1x128xf32, #tpu.memory_space<vmem>>, vector<1x128xf32>
    %7 = vector.broadcast %6 : vector<1x128xf32> to vector<2x128xf32>
    %8 = arith.addf %5, %7 : vector<2x128xf32>
    %cst_8 = arith.constant 0.000000e+00 : f32
    %9 = vector.broadcast %cst_8 : f32 to vector<2x128xf32>
    %10 = arith.maximumf %8, %9 : vector<2x128xf32>
    %11 = arith.truncf %10 : vector<2x128xf32> to vector<2x128xbf16>
    %c0_9 = arith.constant 0 : index
    %c0_10 = arith.constant 0 : index
    %12 = vector.load %arg12[%c0_9, %c0_10] : memref<2x256xbf16, #tpu.memory_space<vmem>>, vector<2x128xbf16>
    tpu.vector_store %arg12[%c0_9, %c0_10], %11 {strides = array<i32>} : memref<2x256xbf16, #tpu.memory_space<vmem>>, vector<2x128xbf16>,
    %c0_11 = arith.constant 0 : index
    %c0_12 = arith.constant 0 : index
    %13 = vector.load %arg12[%c0_11, %c0_12] : memref<2x256xbf16, #tpu.memory_space<vmem>>, vector<2x256xbf16>
    %c0_13 = arith.constant 0 : index
    %c0_14 = arith.constant 0 : index
    %14 = vector.load %arg5[%c0_13, %c0_14] : memref<256x128xbf16, #tpu.memory_space<vmem>>, vector<256x128xbf16>
    %cst_15 = arith.constant dense<0.000000e+00> : vector<2x128xf32>
    %15 = tpu.matmul %13, %14, %cst_15 {dimension_numbers = #tpu.dot_dimension_numbers<[1], [0], [0], [1], [0, 0, 1, 1], [], []>} : vector<2x256xbf16>, vector<256x128xbf16>, vector<2x128xf32> -> vector<2x128xf32>
    %c0_16 = arith.constant 0 : index
    %c0_17 = arith.constant 0 : index
    %16 = vector.load %arg8[%c0_16, %c0_17] : memref<1x384xf32, #tpu.memory_space<vmem>>, vector<1x128xf32>
    %17 = vector.broadcast %16 : vector<1x128xf32> to vector<2x128xf32>
    %18 = arith.addf %15, %17 : vector<2x128xf32>
    %cst_18 = arith.constant 0.000000e+00 : f32
    %19 = vector.broadcast %cst_18 : f32 to vector<2x128xf32>
    %20 = arith.maximumf %18, %19 : vector<2x128xf32>
    %21 = arith.truncf %20 : vector<2x128xf32> to vector<2x128xbf16>
    %c0_19 = arith.constant 0 : index
    %c0_20 = arith.constant 0 : index
    %22 = vector.load %arg12[%c0_19, %c0_20] : memref<2x256xbf16, #tpu.memory_space<vmem>>, vector<2x128xbf16>
    tpu.vector_store %arg12[%c0_19, %c0_20], %21 {strides = array<i32>} : memref<2x256xbf16, #tpu.memory_space<vmem>>, vector<2x128xbf16>,
    %c0_21 = arith.constant 0 : index
    %c0_22 = arith.constant 0 : index
    %23 = vector.load %arg12[%c0_21, %c0_22] : memref<2x256xbf16, #tpu.memory_space<vmem>>, vector<2x256xbf16>
    %c0_23 = arith.constant 0 : index
    %c0_24 = arith.constant 0 : index
    %24 = vector.load %arg6[%c0_23, %c0_24] : memref<256x128xbf16, #tpu.memory_space<vmem>>, vector<256x128xbf16>
    %cst_25 = arith.constant dense<0.000000e+00> : vector<2x128xf32>
    %25 = tpu.matmul %23, %24, %cst_25 {dimension_numbers = #tpu.dot_dimension_numbers<[1], [0], [0], [1], [0, 0, 1, 1], [], []>} : vector<2x256xbf16>, vector<256x128xbf16>, vector<2x128xf32> -> vector<2x128xf32>
    %c0_26 = arith.constant 0 : index
    %c128_27 = arith.constant 128 : index
    %26 = vector.load %arg8[%c0_26, %c128_27] : memref<1x384xf32, #tpu.memory_space<vmem>>, vector<1x128xf32>
    %27 = vector.broadcast %26 : vector<1x128xf32> to vector<2x128xf32>
    %28 = arith.addf %25, %27 : vector<2x128xf32>
    %cst_28 = arith.constant 0.000000e+00 : f32
    %29 = vector.broadcast %cst_28 : f32 to vector<2x128xf32>
    %30 = arith.maximumf %28, %29 : vector<2x128xf32>
    %31 = arith.truncf %30 : vector<2x128xf32> to vector<2x128xbf16>
    %c0_29 = arith.constant 0 : index
    %c0_30 = arith.constant 0 : index
    %32 = vector.load %arg12[%c0_29, %c0_30] : memref<2x256xbf16, #tpu.memory_space<vmem>>, vector<2x128xbf16>
    tpu.vector_store %arg12[%c0_29, %c0_30], %31 {strides = array<i32>} : memref<2x256xbf16, #tpu.memory_space<vmem>>, vector<2x128xbf16>,
    %c0_31 = arith.constant 0 : index
    %c0_32 = arith.constant 0 : index
    %33 = vector.load %arg12[%c0_31, %c0_32] : memref<2x256xbf16, #tpu.memory_space<vmem>>, vector<2x256xbf16>
    %c0_33 = arith.constant 0 : index
    %c0_34 = arith.constant 0 : index
    %34 = vector.load %arg7[%c0_33, %c0_34] : memref<256x128xbf16, #tpu.memory_space<vmem>>, vector<256x128xbf16>
    %cst_35 = arith.constant dense<0.000000e+00> : vector<2x128xf32>
    %35 = tpu.matmul %33, %34, %cst_35 {dimension_numbers = #tpu.dot_dimension_numbers<[1], [0], [0], [1], [0, 0, 1, 1], [], []>} : vector<2x256xbf16>, vector<256x128xbf16>, vector<2x128xf32> -> vector<2x128xf32>
    %c0_36 = arith.constant 0 : index
    %c256 = arith.constant 256 : index
    %36 = vector.load %arg8[%c0_36, %c256] : memref<1x384xf32, #tpu.memory_space<vmem>>, vector<1x128xf32>
    %37 = vector.broadcast %36 : vector<1x128xf32> to vector<2x128xf32>
    %38 = arith.addf %35, %37 : vector<2x128xf32>
    %cst_37 = arith.constant 0.000000e+00 : f32
    %39 = vector.broadcast %cst_37 : f32 to vector<2x128xf32>
    %40 = arith.maximumf %38, %39 : vector<2x128xf32>
    %41 = arith.truncf %40 : vector<2x128xf32> to vector<2x128xbf16>
    %c0_38 = arith.constant 0 : index
    %c0_39 = arith.constant 0 : index
    %42 = vector.load %arg9[%c0_38, %c0_39] : memref<128x1024xbf16, #tpu.memory_space<vmem>>, vector<128x1024xbf16>
    %cst_40 = arith.constant dense<0.000000e+00> : vector<2x1024xf32>
    %43 = tpu.matmul %41, %42, %cst_40 {dimension_numbers = #tpu.dot_dimension_numbers<[1], [0], [0], [1], [0, 0, 1, 1], [], []>} : vector<2x128xbf16>, vector<128x1024xbf16>, vector<2x1024xf32> -> vector<2x1024xf32>
    %c0_41 = arith.constant 0 : index
    %c0_42 = arith.constant 0 : index
    %44 = vector.load %arg10[%c0_41, %c0_42] : memref<1x1024xf32, #tpu.memory_space<vmem>>, vector<1x1024xf32>
    %45 = vector.broadcast %44 : vector<1x1024xf32> to vector<2x1024xf32>
    %46 = arith.addf %43, %45 : vector<2x1024xf32>
    %c0_43 = arith.constant 0 : index
    %c0_44 = arith.constant 0 : index
    %47 = vector.load %arg11[%c0_43, %c0_44] : memref<2x1024xf32, #tpu.memory_space<vmem>>, vector<2x1024xf32>
    tpu.vector_store %arg11[%c0_43, %c0_44], %46 {strides = array<i32>} : memref<2x1024xf32, #tpu.memory_space<vmem>>, vector<2x1024xf32>,
    return
  }
  func.func @transform_0(%arg0: i32) -> (i32, i32) {
    %c0_i32 = arith.constant 0 : i32
    %c0_i32_0 = arith.constant 0 : i32
    return %arg0, %c0_i32 : i32, i32
  }
  func.func @transform_1(%arg0: i32) -> (i32, i32) {
    %c0_i32 = arith.constant 0 : i32
    %c0_i32_0 = arith.constant 0 : i32
    return %arg0, %c0_i32 : i32, i32
  }
  func.func @transform_2(%arg0: i32) -> (i32, i32) {
    %c0_i32 = arith.constant 0 : i32
    %c0_i32_0 = arith.constant 0 : i32
    %c0_i32_1 = arith.constant 0 : i32
    return %c0_i32, %c0_i32_0 : i32, i32
  }
  func.func @transform_3(%arg0: i32) -> (i32, i32) {
    %c0_i32 = arith.constant 0 : i32
    %c0_i32_0 = arith.constant 0 : i32
    %c0_i32_1 = arith.constant 0 : i32
    return %c0_i32, %c0_i32_0 : i32, i32
  }
  func.func @transform_4(%arg0: i32) -> (i32, i32) {
    %c0_i32 = arith.constant 0 : i32
    %c0_i32_0 = arith.constant 0 : i32
    %c0_i32_1 = arith.constant 0 : i32
    return %c0_i32, %c0_i32_0 : i32, i32
  }
  func.func @transform_5(%arg0: i32) -> (i32, i32) {
    %c0_i32 = arith.constant 0 : i32
    %c0_i32_0 = arith.constant 0 : i32
    %c0_i32_1 = arith.constant 0 : i32
    return %c0_i32, %c0_i32_0 : i32, i32
  }
  func.func @transform_6(%arg0: i32) -> (i32, i32) {
    %c0_i32 = arith.constant 0 : i32
    %c0_i32_0 = arith.constant 0 : i32
    %c0_i32_1 = arith.constant 0 : i32
    return %c0_i32, %c0_i32_0 : i32, i32
  }
  func.func @transform_7(%arg0: i32) -> (i32, i32) {
    %c0_i32 = arith.constant 0 : i32
    %c0_i32_0 = arith.constant 0 : i32
    %c0_i32_1 = arith.constant 0 : i32
    return %c0_i32, %c0_i32_0 : i32, i32
  }
  func.func @transform_8(%arg0: i32) -> (i32, i32) {
    %c0_i32 = arith.constant 0 : i32
    %c0_i32_0 = arith.constant 0 : i32
    %c0_i32_1 = arith.constant 0 : i32
    return %c0_i32, %c0_i32_0 : i32, i32
  }
  func.func @transform_9(%arg0: i32) -> (i32, i32) {
    %c0_i32 = arith.constant 0 : i32
    %c0_i32_0 = arith.constant 0 : i32
    %c0_i32_1 = arith.constant 0 : i32
    return %c0_i32, %c0_i32_0 : i32, i32
  }
  func.func @transform_10(%arg0: i32) -> (i32, i32) {
    %c0_i32 = arith.constant 0 : i32
    %c0_i32_0 = arith.constant 0 : i32
    return %arg0, %c0_i32 : i32, i32
  }
}

</mosaic_0001>

<bundles_post_ra>
// kernel: tpu_custom_call.1
= control target key start
LH: loop header
LB: loop body
LE: loop exit
PB: predicated region body
PF: predicated region fallthrough
CT: control target
= control target key end

     0   :  { %15 = vsyncpa [#allocation4], 0  ;;  %s2891_s0 = inlined_call_operand.hbm [shape: f32[2,1024], index: 0, kind: input, shape index: {}]   ;;  %s2892_s1 = inlined_call_operand.vmem [shape: bf16[2,128], index: 1, kind: input, shape index: {}]   ;;  %s2893_s2 = inlined_call_operand.hbm [shape: bf16[1024,128], index: 2, kind: input, shape index: {}]   ;;  %s2894_s3 = inlined_call_operand.vmem [shape: f32[1,128], index: 3, kind: input, shape index: {}]   ;;  %s2895_s4 = inlined_call_operand.hbm [shape: bf16[256,128], index: 4, kind: input, shape index: {}]   ;;  %s2896_s5 = inlined_call_operand.hbm [shape: bf16[256,128], index: 5, kind: input, shape index: {}]   ;;  %s2897_s6 = inlined_call_operand.hbm [shape: bf16[256,128], index: 6, kind: input, shape index: {}]   ;;  %s2898_s7 = inlined_call_operand.vmem [shape: f32[1,384], index: 7, kind: input, shape index: {}]   ;;  %s2899_s8 = inlined_call_operand.hbm [shape: bf16[128,1024], index: 8, kind: input, shape index: {}]   ;;  %s2900_s9 = inlined_call_operand.vmem [shape: f32[1,1024], index: 9, kind: input, shape index: {}]   ;;  %s2901_s10 = inlined_call_operand.hbm [shape: f32[2,1024], index: 10, kind: output, shape index: {}]  }
   0x1   :  { %16 = vsyncpa [#allocation7], 0 }
   0x2   :  { %17 = vsyncpa [#allocation10], 0 }
   0x3   :  { %18 = vsyncpa [#allocation13], 0 }
   0x4   :  { %19 = vsyncpa [#allocation5], 0  ;;  %s2735_s13 = smov [#allocation6]  }
   0x5   :  { %s37_s14 = sshll.u32 %s2735_s13, 4  ;;  %s38_s14 = int_to_ptr.vmem [resolvable:$true] %s37_s14 }
   0x6   :  { %s2593_s15 = scalar_lea.vmem %s38_s14, 8192  ;;  %p2598_p1 = scmp.lt.s32.totalorder %s38_s14, %s38_s14 }
   0x7   :  { %p2594_p0 = scmp.ne.s32.totalorder %s38_s14, %s2593_s15  ;;  %p2599_p2 = scmp.lt.s32.totalorder %s2593_s15, %s2593_s15 }
   0x9   :  { %p2600_p3 = por %p2599_p2, %p2598_p1 }
   0xb   :  { %p2601_p4 = pnand %p2600_p3, %p2594_p0 }
   0xd   :  { %2604 = shalt.err (!%p2601_p4)
}
   0xe   :  { %s2736_s16 = smov 64   ;;  %s2737_s17 = smov 4  }
   0xf   :  { %43 = dma.hbm_to_vmem [thread:$0]  %s2893_s2, 8192, %s38_s14, [#allocation7], %s2736_s16, %s2736_s16, %s2737_s17  }
  0x10   :  { %s2738_s20 = smov [#allocation9]   ;;  %s2739_s22 = smov [#allocation3]  }
  0x11   :  { %s63_s21 = sshll.u32 %s2738_s20, 4  ;;  %s26_s23 = sshll.u32 %s2739_s22, 4  ;;  %s64_s21 = int_to_ptr.vmem [resolvable:$true] %s63_s21  ;;  %s27_s23 = int_to_ptr.vmem [resolvable:$true] %s26_s23 }
  0x12   :  { %s2613_s24 = scalar_lea.vmem %s64_s21, 2048  ;;  %p2618_p6 = scmp.lt.s32.totalorder %s64_s21, %s64_s21 }
  0x13   :  { %p2614_p5 = scmp.ne.s32.totalorder %s64_s21, %s2613_s24  ;;  %p2619_p7 = scmp.lt.s32.totalorder %s2613_s24, %s2613_s24 }
  0x15   :  { %p2620_p8 = por %p2619_p7, %p2618_p6 }
  0x17   :  { %p2621_p9 = pnand %p2620_p8, %p2614_p5 }
  0x19   :  { %2624 = shalt.err (!%p2621_p9)
}
  0x1a   :  { %69 = dma.hbm_to_vmem [thread:$0]  %s2896_s5, 2048, %s64_s21, [#allocation10], %s2736_s16, %s2736_s16, %s2737_s17  }
  0x1b   :  { %s2633_s2 = scalar_lea.vmem %s27_s23, 256  ;;  %p2638_p11 = scmp.lt.s32.totalorder %s27_s23, %s27_s23 }
  0x1c   :  { %p2634_p10 = scmp.ne.s32.totalorder %s27_s23, %s2633_s2  ;;  %p2639_p12 = scmp.lt.s32.totalorder %s2633_s2, %s2633_s2 }
  0x1e   :  { %p2640_p13 = por %p2639_p12, %p2638_p11 }
  0x20   :  { %p2641_p0 = pnand %p2640_p13, %p2634_p10 }
  0x22   :  { %2644 = shalt.err (!%p2641_p0)
}
  0x23   :  { %29 = dma.hbm_to_vmem [thread:$0]  %s2891_s0, 256, %s27_s23, [#allocation4]  }
  0x24   :  { %s2740_s29 = smov [#allocation8]   ;;  %s2741_s11 = smov [#allocation11]  }
  0x25   :  { %s51_s30 = sshll.u32 %s2740_s29, 4  ;;  %s75_s12 = sshll.u32 %s2741_s11, 4  ;;  %s52_s30 = int_to_ptr.vmem [resolvable:$true] %s51_s30  ;;  %s76_s12 = int_to_ptr.vmem [resolvable:$true] %s75_s12 }
  0x26   :  { %s2653_s13 = scalar_lea.vmem %s52_s30, 2048  ;;  %p2658_p2 = scmp.lt.s32.totalorder %s52_s30, %s52_s30 }
  0x27   :  { %p2654_p1 = scmp.ne.s32.totalorder %s52_s30, %s2653_s13  ;;  %p2659_p3 = scmp.lt.s32.totalorder %s2653_s13, %s2653_s13 }
  0x29   :  { %p2660_p4 = por %p2659_p3, %p2658_p2 }
  0x2b   :  { %p2661_p5 = pnand %p2660_p4, %p2654_p1 }
  0x2d   :  { %2664 = shalt.err (!%p2661_p5)
}
  0x2e   :  { %57 = dma.hbm_to_vmem [thread:$0]  %s2895_s4, 2048, %s52_s30, [#allocation7], %s2736_s16, %s2736_s16, %s2737_s17  }
  0x2f   :  { %s2673_s0 = scalar_lea.vmem %s76_s12, 2048  ;;  %p2678_p7 = scmp.lt.s32.totalorder %s76_s12, %s76_s12 }
  0x30   :  { %p2674_p6 = scmp.ne.s32.totalorder %s76_s12, %s2673_s0  ;;  %p2679_p8 = scmp.lt.s32.totalorder %s2673_s0, %s2673_s0 }
  0x32   :  { %p2680_p9 = por %p2679_p8, %p2678_p7 }
  0x34   :  { %p2681_p10 = pnand %p2680_p9, %p2674_p6 }
  0x36   :  { %2684 = shalt.err (!%p2681_p10)
}
  0x37   :  { %81 = dma.hbm_to_vmem [thread:$0]  %s2897_s6, 2048, %s76_s12, [#allocation10], %s2736_s16, %s2736_s16, %s2737_s17  }
  0x38   :  { %s2742_s19 = smov [#allocation12]  }
  0x39   :  { %s89_s20 = sshll.u32 %s2742_s19, 4  ;;  %s90_s20 = int_to_ptr.vmem [resolvable:$true] %s89_s20 }
  0x3a   :  { %s2693_s21 = scalar_lea.vmem %s90_s20, 8192  ;;  %p2698_p12 = scmp.lt.s32.totalorder %s90_s20, %s90_s20 }
  0x3b   :  { %p2694_p11 = scmp.ne.s32.totalorder %s90_s20, %s2693_s21  ;;  %p2699_p13 = scmp.lt.s32.totalorder %s2693_s21, %s2693_s21 }
  0x3d   :  { %p2700_p0 = por %p2699_p13, %p2698_p12 }
  0x3f   :  { %p2701_p1 = pnand %p2700_p0, %p2694_p11 }
  0x41   :  { %2704 = shalt.err (!%p2701_p1)
}
  0x42   :  { %s2743_s4 = smov 512   ;;  %s2744_s22 = smov 32  }
  0x43   :  { %95 = dma.hbm_to_vmem [thread:$0]  %s2899_s8, 8192, %s90_s20, [#allocation13], %s2743_s4, %s2743_s4, %s2744_s22  }
  0x44   :  { %2725 = dma.done.wait [#allocation4], 256  }
  0x45   :  { %2726 = vsyncadd [#allocation4], 4294967040 }
  0x46   :  { %2727 = dma.done.wait [#allocation7], 10240  }
  0x47   :  { %2728 = vsyncadd [#allocation7], 4294957056 }
  0x48   :  { %2729 = dma.done.wait [#allocation10], 4096  }
  0x49   :  { %2730 = vsyncadd [#allocation10], 4294963200 }
  0x4a   :  { %2731 = dma.done.wait [#allocation13], 8192  }
  0x4b   :  { %2732 = vsyncadd [#allocation13], 4294959104  ;;  %v2471_v0 = vld [vmem:[#allocation6 + $0x78] sm:$0xff]   ;;  %v2475_v4 = vld [vmem:[#allocation6 + $0x70] sm:$0xff]   ;;  %v2745_v22 = vmov 1983009808   ;;  %v125_v24 = vlaneseq }
  0x4c   :  { %v2472_v1 = vld [vmem:[#allocation6 + $0xf8] sm:$0xff]   ;;  %2303 = vmatprep.subr.bf16.mxu0 %v2471_v0  ;;  %v2476_v5 = vld [vmem:[#allocation6 + $0xf0] sm:$0xff]   ;;  %v2479_v8 = vld [vmem:[#allocation6 + $0x68] sm:$0xff]   ;;  %v123_v23 = vunpack.c.l.s4 %v2745_v22 }
  0x4d   :  { %v2473_v2 = vld [vmem:[#allocation6 + $0x38] sm:$0xff]   ;;  %2325 = vmatprep.subr.bf16.mxu1 %v2472_v1  ;;  %v2477_v6 = vld [vmem:[#allocation6 + $0x30] sm:$0xff]   ;;  %v2480_v9 = vld [vmem:[#allocation6 + $0xe8] sm:$0xff]   ;;  %v2834_v30 = vshrl.u32 %v125_v24, 7 }
  0x4e   :  { %v2474_v3 = vld [vmem:[#allocation6 + $0xb8] sm:$0xff]   ;;  %2304 = vmatpush3.bf16.msra.mxu0 %v2473_v2  ;;  %v2478_v7 = vld [vmem:[#allocation6 + $0xb0] sm:$0xff]   ;;  %v2481_v10 = vld [vmem:[#allocation6 + $0x28] sm:$0xff]   ;;  %v124_v29 = vunpack.c.0.s8 %v123_v23 }
  0x4f   :  { %2326 = vmatpush3.bf16.msra.mxu1 %v2474_v3  ;;  %2305 = vmatprep.subr.bf16.mxu0 %v2475_v4  ;;  %v2482_v11 = vld [vmem:[#allocation6 + $0xa8] sm:$0xff]   ;;  %v2483_v12 = vld [vmem:[#allocation6 + $0x60] sm:$0xff]   ;;  %v2487_v16 = vld [vmem:[#allocation6 + $0x58] sm:$0xff]  }
  0x50   :  { %2327 = vmatprep.subr.bf16.mxu1 %v2476_v5  ;;  %v2484_v13 = vld [vmem:[#allocation6 + $0xe0] sm:$0xff]   ;;  %v2488_v17 = vld [vmem:[#allocation6 + $0xd8] sm:$0xff]   ;;  %v2491_v20 = vld [vmem:[#allocation6 + $0x50] sm:$0xff]   ;;  %v2837_v35 = vsub.s32 %v124_v29, %v2834_v30 }
  0x51   :  { %v2485_v14 = vld [vmem:[#allocation6 + $0x20] sm:$0xff]   ;;  %v2489_v18 = vld [vmem:[#allocation6 + $0x18] sm:$0xff]   ;;  %v2492_v21 = vld [vmem:[#allocation6 + $0xd0] sm:$0xff]  }
  0x52   :  { %2306 = vmatpush3.bf16.msra.mxu0 %v2477_v6  ;;  %v2486_v15 = vld [vmem:[#allocation6 + $0xa0] sm:$0xff]   ;;  %v2490_v19 = vld [vmem:[#allocation6 + $0x98] sm:$0xff]   ;;  %v2493_v25 = vld [vmem:[#allocation6 + $0x10] sm:$0xff]  }
  0x53   :  { %2328 = vmatpush3.bf16.msra.mxu1 %v2478_v7  ;;  %2307 = vmatprep.subr.bf16.mxu0 %v2479_v8  ;;  %v2494_v26 = vld [vmem:[#allocation6 + $0x90] sm:$0xff]   ;;  %v2495_v27 = vld [vmem:[#allocation6 + $0x48] sm:$0xff]   ;;  %v2499_v33 = vld [vmem:[#allocation6 + $0x40] sm:$0xff]  }
  0x54   :  { %2329 = vmatprep.subr.bf16.mxu1 %v2480_v9  ;;  %v2496_v28 = vld [vmem:[#allocation6 + $0xc8] sm:$0xff]   ;;  %v2500_v34 = vld [vmem:[#allocation6 + $0xc0] sm:$0xff]   ;;  %v117_v38 = vld [vmem:[#allocation3] sm:$0xff] }
  0x55   :  { %v2497_v31 = vld [vmem:[#allocation6 + $0x8] sm:$0xff]   ;;  %v2501_v36 = vld [vmem:[#allocation6] sm:$0xff]   ;;  %v128_v39 = vrot.slane %v117_v38, %v2837_v35  ;;  %v121_v40 = vcombine.high %v117_v38, %v117_v38  ;;  %v2504_v41 = vld [vmem:[#allocation6 + $0x178] sm:$0xff]  }
  0x56   :  { %2308 = vmatpush3.bf16.msra.mxu0 %v2481_v10  ;;  %v2498_v32 = vld [vmem:[#allocation6 + $0x88] sm:$0xff]   ;;  %v2502_v37 = vld [vmem:[#allocation6 + $0x80] sm:$0xff]   ;;  %v2505_v42 = vld [vmem:[#allocation6 + $0x1f8] sm:$0xff]  }
  0x57   :  { %2330 = vmatpush3.bf16.msra.mxu1 %v2482_v11  ;;  %2309 = vmatprep.subr.bf16.mxu0 %v2483_v12  ;;  %v136_v43 = vcombine.high %v128_v39, %v128_v39  ;;  %v135_v44 = vrot.slane %v121_v40, %v2837_v35  ;;  %v163_v45 = vpack.c.bf16 %v128_v39, %v128_v39  ;;  %v2506_v46 = vld [vmem:[#allocation6 + $0x138] sm:$0xff]   ;;  %v2508_v51 = vld [vmem:[#allocation6 + $0x170] sm:$0xff]   ;;  %v2512_v56 = vld [vmem:[#allocation6 + $0x168] sm:$0xff]  }
  0x58   :  { %2331 = vmatprep.subr.bf16.mxu1 %v2484_v13  ;;  %v2507_v49 = vld [vmem:[#allocation6 + $0x1b8] sm:$0xff]   ;;  %v2509_v53 = vld [vmem:[#allocation6 + $0x1f0] sm:$0xff]   ;;  %v2513_v57 = vld [vmem:[#allocation6 + $0x1e8] sm:$0xff]  }
  0x59   :  { %v164_v47 = vpack.c.bf16 %v136_v43, %v136_v43  ;;  %v137_v48 = vcombine.high %v135_v44, %v135_v44  ;;  %v165_v50 = vpack.c.bf16 %v135_v44, %v135_v44  ;;  %v2510_v54 = vld [vmem:[#allocation6 + $0x130] sm:$0xff]   ;;  %v2514_v58 = vld [vmem:[#allocation6 + $0x128] sm:$0xff]   ;;  %v2516_v60 = vld [vmem:[#allocation6 + $0x160] sm:$0xff]  }
  0x5a   :  { %2310 = vmatpush3.bf16.msra.mxu0 %v2485_v14  ;;  %v2511_v55 = vld [vmem:[#allocation6 + $0x1b0] sm:$0xff]   ;;  %v2515_v59 = vld [vmem:[#allocation6 + $0x1a8] sm:$0xff]   ;;  %v2517_v61 = vld [vmem:[#allocation6 + $0x1e0] sm:$0xff]  }
  0x5b   :  { %2332 = vmatpush3.bf16.msra.mxu1 %v2486_v15  ;;  %2311 = vmatprep.subr.bf16.mxu0 %v2487_v16  ;;  %v166_v52 = vpack.c.bf16 %v137_v48, %v137_v48  ;;  %v2518_v62 = vld [vmem:[#allocation6 + $0x120] sm:$0xff]   ;;  %v2520_v0 = vld [vmem:[#allocation6 + $0x158] sm:$0xff]   ;;  %v2524_v4 = vld [vmem:[#allocation6 + $0x150] sm:$0xff]  }
  0x5c   :  { %2333 = vmatprep.subr.bf16.mxu1 %v2488_v17  ;;  %724 = vmatprep.mubr.bf16.mxu0 %v164_v47  ;;  %v2519_v63 = vld [vmem:[#allocation6 + $0x1a0] sm:$0xff]   ;;  %v2521_v1 = vld [vmem:[#allocation6 + $0x1d8] sm:$0xff]   ;;  %v2525_v5 = vld [vmem:[#allocation6 + $0x1d0] sm:$0xff]  }
  0x5d   :  { %764 = vmatprep.mubr.bf16.mxu1 %v166_v52  ;;  %v2522_v2 = vld [vmem:[#allocation6 + $0x118] sm:$0xff]   ;;  %v2526_v6 = vld [vmem:[#allocation6 + $0x110] sm:$0xff]   ;;  %v2528_v8 = vld [vmem:[#allocation6 + $0x148] sm:$0xff]  }
  0x5e   :  { %2312 = vmatpush3.bf16.msra.mxu0 %v2489_v18  ;;  %v2523_v3 = vld [vmem:[#allocation6 + $0x198] sm:$0xff]   ;;  %v2527_v7 = vld [vmem:[#allocation6 + $0x190] sm:$0xff]   ;;  %v2529_v9 = vld [vmem:[#allocation6 + $0x1c8] sm:$0xff]  }
  0x5f   :  { %2334 = vmatpush3.bf16.msra.mxu1 %v2490_v19  ;;  %2313 = vmatprep.subr.bf16.mxu0 %v2491_v20  ;;  %v2530_v10 = vld [vmem:[#allocation6 + $0x108] sm:$0xff]   ;;  %v2532_v12 = vld [vmem:[#allocation6 + $0x140] sm:$0xff]   ;;  %v118_v15 = vld [vmem:[#allocation3 + $0x8] sm:$0xff] }
  0x60   :  { %2335 = vmatprep.subr.bf16.mxu1 %v2492_v21  ;;  %v2531_v11 = vld [vmem:[#allocation6 + $0x188] sm:$0xff]   ;;  %v2533_v13 = vld [vmem:[#allocation6 + $0x1c0] sm:$0xff]   ;;  %v145_v17 = vrot.slane %v118_v15, %v2837_v35  ;;  %v138_v18 = vcombine.high %v118_v15, %v118_v15  ;;  %v2540_v29 = vld [vmem:[#allocation8 + $0x30] sm:$0xff]  }
  0x61   :  { %v2534_v14 = vld [vmem:[#allocation6 + $0x100] sm:$0xff]   ;;  %v2547_v38 = vld [vmem:[#allocation8 + $0x50] sm:$0xff]   ;;  %v2549_v40 = vld [vmem:[#allocation8 + $0x48] sm:$0xff]  }
  0x62   :  { %2314 = vmatpush3.bf16.msra.mxu0 %v2493_v25  ;;  %v2535_v16 = vld [vmem:[#allocation6 + $0x180] sm:$0xff]   ;;  %v153_v19 = vcombine.high %v145_v17, %v145_v17  ;;  %v152_v20 = vrot.slane %v138_v18, %v2837_v35  ;;  %v167_v21 = vpack.c.bf16 %v145_v17, %v145_v17  ;;  %v2548_v39 = vld [vmem:[#allocation8 + $0x10] sm:$0xff]  }
  0x63   :  { %2336 = vmatpush3.bf16.msra.mxu1 %v2494_v26  ;;  %2315 = vmatprep.subr.bf16.mxu0 %v2495_v27  ;;  %v2537_v26 = vld [vmem:[#allocation8 + $0x78] sm:$0xff]   ;;  %v2551_v43 = vld [vmem:[#allocation8 + $0x40] sm:$0xff]   ;;  %v2555_v47 = vld [vmem:[#allocation9 + $0x70] sm:$0xff]  }
  0x64   :  { %2337 = vmatprep.subr.bf16.mxu1 %v2496_v28  ;;  %v168_v22 = vpack.c.bf16 %v153_v19, %v153_v19  ;;  %v154_v23 = vcombine.high %v152_v20, %v152_v20  ;;  %v169_v24 = vpack.c.bf16 %v152_v20, %v152_v20  ;;  %v2538_v27 = vld [vmem:[#allocation8 + $0x38] sm:$0xff]   ;;  %v2539_v28 = vld [vmem:[#allocation8 + $0x70] sm:$0xff]   ;;  %v2552_v44 = vld [vmem:[#allocation8] sm:$0xff]  }
  0x65   :  { %v2556_v48 = vld [vmem:[#allocation9 + $0x30] sm:$0xff]   ;;  %v2557_v20 = vld [vmem:[#allocation9 + $0x68] sm:$0xff]  }
  0x66   :  { %2316 = vmatpush3.bf16.msra.mxu0 %v2497_v31  ;;  %v170_v25 = vpack.c.bf16 %v154_v23, %v154_v23  ;;  %v2541_v31 = vld [vmem:[#allocation8 + $0x68] sm:$0xff]   ;;  %v2560_v23 = vld [vmem:[#allocation9 + $0x20] sm:$0xff]  }
  0x67   :  { %2338 = vmatpush3.bf16.msra.mxu1 %v2498_v32  ;;  %2317 = vmatprep.subr.bf16.mxu0 %v2499_v33  ;;  %v2542_v32 = vld [vmem:[#allocation8 + $0x28] sm:$0xff]   ;;  %v2543_v33 = vld [vmem:[#allocation8 + $0x60] sm:$0xff]  }
  0x68   :  { %2339 = vmatprep.subr.bf16.mxu1 %v2500_v34  ;;  %v2544_v34 = vld [vmem:[#allocation8 + $0x20] sm:$0xff]  }
  0x6a   :  { %2318 = vmatpush3.bf16.msra.mxu0 %v2501_v36  ;;  %v2545_v36 = vld [vmem:[#allocation8 + $0x58] sm:$0xff]  }
  0x6b   :  { %2340 = vmatpush3.bf16.msra.mxu1 %v2502_v37  ;;  %2347 = vmatprep.subr.bf16.mxu0 %v2504_v41  ;;  %v2546_v37 = vld [vmem:[#allocation8 + $0x18] sm:$0xff]   ;;  %v171_v41 = vld [vmem:[%s2892_s1] sm:$0x1] }
  0x6c   :  { %2369 = vmatprep.subr.bf16.mxu1 %v2505_v42  ;;  %172 = vst [vmem:[#allocation2 + $0x1] sm:$0x1] %v171_v41  ;;  %v2550_v42 = vld [vmem:[#allocation8 + $0x8] sm:$0xff]  }
  0x6d   :  { %725 = vmatmul.mubr.bf16.vlgmr.msra.gmra.mxu0 %v163_v45  ;;  %v2553_v45 = vld [vmem:[#allocation9 + $0x78] sm:$0xff]  }
  0x6e   :  { %2348 = vmatpush3.bf16.msra.mxu0 %v2506_v46  ;;  %765 = vmatmul.mubr.bf16.vlgmr.msra.gmra.mxu1 %v165_v50  ;;  %v2554_v46 = vld [vmem:[#allocation9 + $0x38] sm:$0xff]  }
  0x6f   :  { %2349 = vmatprep.subr.bf16.mxu0 %v2508_v51  ;;  %2370 = vmatpush3.bf16.msra.mxu1 %v2507_v49 }
  0x70   :  { %2371 = vmatprep.subr.bf16.mxu1 %v2509_v53  ;;  %804 = vmatprep.mubr.bf16.mxu0 %v168_v22  ;;  %v2559_v22 = vld [vmem:[#allocation9 + $0x60] sm:$0xff]  }
  0x71   :  { %844 = vmatprep.mubr.bf16.mxu1 %v170_v25  ;;  %v2562_v25 = vld [vmem:[#allocation9 + $0x18] sm:$0xff]  }
  0x72   :  { %2350 = vmatpush3.bf16.msra.mxu0 %v2510_v54 }
  0x73   :  { %2351 = vmatprep.subr.bf16.mxu0 %v2512_v56  ;;  %2372 = vmatpush3.bf16.msra.mxu1 %v2511_v55 }
  0x74   :  { %2373 = vmatprep.subr.bf16.mxu1 %v2513_v57 }
  0x76   :  { %2352 = vmatpush3.bf16.msra.mxu0 %v2514_v58  ;;  %v2120_v58 = vld [vmem:[%s2894_s3] ss:$0 sm:$0xff] }
  0x77   :  { %2353 = vmatprep.subr.bf16.mxu0 %v2516_v60  ;;  %2374 = vmatpush3.bf16.msra.mxu1 %v2515_v59 }
  0x78   :  { %2375 = vmatprep.subr.bf16.mxu1 %v2517_v61 }
  0x7a   :  { %2354 = vmatpush3.bf16.msra.mxu0 %v2518_v62 }
  0x7b   :  { %2355 = vmatprep.subr.bf16.mxu0 %v2520_v0  ;;  %2376 = vmatpush3.bf16.msra.mxu1 %v2519_v63 }
  0x7c   :  { %2377 = vmatprep.subr.bf16.mxu1 %v2521_v1 }
  0x7e   :  { %2356 = vmatpush3.bf16.msra.mxu0 %v2522_v2 }
  0x7f   :  { %2357 = vmatprep.subr.bf16.mxu0 %v2524_v4  ;;  %2378 = vmatpush3.bf16.msra.mxu1 %v2523_v3 }
  0x80   :  { %2379 = vmatprep.subr.bf16.mxu1 %v2525_v5 }
  0x82   :  { %2358 = vmatpush3.bf16.msra.mxu0 %v2526_v6 }
  0x83   :  { %2359 = vmatprep.subr.bf16.mxu0 %v2528_v8  ;;  %2380 = vmatpush3.bf16.msra.mxu1 %v2527_v7 }
  0x84   :  { %2381 = vmatprep.subr.bf16.mxu1 %v2529_v9 }
  0x86   :  { %2360 = vmatpush3.bf16.msra.mxu0 %v2530_v10 }
  0x87   :  { %2361 = vmatprep.subr.bf16.mxu0 %v2532_v12  ;;  %2382 = vmatpush3.bf16.msra.mxu1 %v2531_v11  ;;  %v2746_v12 = vmov 1966171168  }
  0x88   :  { %2383 = vmatprep.subr.bf16.mxu1 %v2533_v13  ;;  %v905_v13 = vunpack.c.l.s4 %v2746_v12  ;;  %v1510_v12 = vld [vmem:[#allocation12 + $0x160] sm:$0xff] }
  0x8a   :  { %2362 = vmatpush3.bf16.msra.mxu0 %v2534_v14  ;;  %v906_v14 = vunpack.c.0.s8 %v905_v13 }
  0x8b   :  { %2384 = vmatpush3.bf16.msra.mxu1 %v2535_v16  ;;  %2391 = vmatprep.subr.bf16.mxu0 %v2537_v26  ;;  %v2563_v26 = vld [vmem:[#allocation9 + $0x50] sm:$0xff]  }
  0x8c   :  { %2413 = vmatprep.subr.bf16.mxu1 %v2553_v45  ;;  %v2850_v16 = vsub.s32 %v906_v14, %v2834_v30 }
  0x8d   :  { %805 = vmatmul.mubr.bf16.vlgmr.msra.gmra.mxu0 %v167_v21  ;;  %v2558_v21 = vld [vmem:[#allocation9 + $0x28] sm:$0xff]  }
  0x8e   :  { %845 = vmatmul.mubr.bf16.vlgmr.msra.gmra.mxu1 %v169_v24  ;;  %2392 = vmatpush3.bf16.msra.mxu0 %v2538_v27  ;;  %v2561_v24 = vld [vmem:[#allocation9 + $0x58] sm:$0xff]   ;;  %v2564_v27 = vld [vmem:[#allocation9 + $0x10] sm:$0xff]  }
  0x8f   :  { %2393 = vmatprep.subr.bf16.mxu0 %v2539_v28  ;;  %2414 = vmatpush3.bf16.msra.mxu1 %v2554_v46  ;;  %v2565_v28 = vld [vmem:[#allocation9 + $0x48] sm:$0xff]  }
  0x90   :  { %2415 = vmatprep.subr.bf16.mxu1 %v2555_v47 }
  0x92   :  { %2394 = vmatpush3.bf16.msra.mxu0 %v2540_v29  ;;  %v2566_v29 = vld [vmem:[#allocation9 + $0x8] sm:$0xff]  }
  0x93   :  { %2395 = vmatprep.subr.bf16.mxu0 %v2541_v31  ;;  %2416 = vmatpush3.bf16.msra.mxu1 %v2556_v48  ;;  %v2567_v31 = vld [vmem:[#allocation9 + $0x40] sm:$0xff]  }
  0x94   :  { %2417 = vmatprep.subr.bf16.mxu1 %v2557_v20  ;;  %v1490_v20 = vld [vmem:[#allocation12 + $0xc0] sm:$0xff] }
  0x96   :  { %2396 = vmatpush3.bf16.msra.mxu0 %v2542_v32  ;;  %v2568_v32 = vld [vmem:[#allocation9] sm:$0xff]  }
  0x97   :  { %2397 = vmatprep.subr.bf16.mxu0 %v2543_v33  ;;  %2418 = vmatpush3.bf16.msra.mxu1 %v2558_v21  ;;  %v2569_v33 = vld [vmem:[#allocation11 + $0x78] sm:$0xff]   ;;  %v1494_v21 = vld [vmem:[#allocation12 + $0xe0] sm:$0xff] }
  0x98   :  { %2419 = vmatprep.subr.bf16.mxu1 %v2559_v22  ;;  %v2264_v22 = vcombine.high %v1490_v20, %v1494_v21 }
  0x9a   :  { %2398 = vmatpush3.bf16.msra.mxu0 %v2544_v34  ;;  %v2570_v34 = vld [vmem:[#allocation11 + $0x38] sm:$0xff]  }
  0x9b   :  { %2399 = vmatprep.subr.bf16.mxu0 %v2545_v36  ;;  %2420 = vmatpush3.bf16.msra.mxu1 %v2560_v23  ;;  %v2571_v36 = vld [vmem:[#allocation11 + $0x70] sm:$0xff]   ;;  %v2263_v23 = vcombine.low %v1490_v20, %v1494_v21  ;;  %v1529_v21 = vld [vmem:[#allocation12 + $0x1f8] sm:$0xff] }
  0x9c   :  { %2421 = vmatprep.subr.bf16.mxu1 %v2561_v24  ;;  %v1482_v24 = vld [vmem:[#allocation12 + $0x80] sm:$0xff] }
  0x9e   :  { %2400 = vmatpush3.bf16.msra.mxu0 %v2546_v37  ;;  %v2572_v37 = vld [vmem:[#allocation11 + $0x30] sm:$0xff]  }
  0x9f   :  { %2401 = vmatprep.subr.bf16.mxu0 %v2547_v38  ;;  %2422 = vmatpush3.bf16.msra.mxu1 %v2562_v25  ;;  %v1486_v25 = vld [vmem:[#allocation12 + $0xa0] sm:$0xff] }
  0xa0   :  { %2423 = vmatprep.subr.bf16.mxu1 %v2563_v26  ;;  %v2256_v26 = vcombine.high %v1482_v24, %v1486_v25 }
  0xa2   :  { %2402 = vmatpush3.bf16.msra.mxu0 %v2548_v39  ;;  %v2185_v39 = vld [vmem:[%s2898_s7] ss:$0 sm:$0xff] }
  0xa3   :  { %2403 = vmatprep.subr.bf16.mxu0 %v2549_v40  ;;  %2424 = vmatpush3.bf16.msra.mxu1 %v2564_v27  ;;  %v2255_v27 = vcombine.low %v1482_v24, %v1486_v25  ;;  %v2221_v25 = vld [vmem:[%s2898_s7 + $0x2] ss:$0 sm:$0xff] }
  0xa4   :  { %2425 = vmatprep.subr.bf16.mxu1 %v2565_v28 }
  0xa6   :  { %2404 = vmatpush3.bf16.msra.mxu0 %v2550_v42 }
  0xa7   :  { %2405 = vmatprep.subr.bf16.mxu0 %v2551_v43  ;;  %2426 = vmatpush3.bf16.msra.mxu1 %v2566_v29  ;;  %v2203_v29 = vld [vmem:[%s2898_s7 + $0x1] ss:$0 sm:$0xff] }
  0xa8   :  { %2427 = vmatprep.subr.bf16.mxu1 %v2567_v31 }
  0xaa   :  { %2406 = vmatpush3.bf16.msra.mxu0 %v2552_v44 }
  0xab   :  { %2428 = vmatpush3.bf16.msra.mxu1 %v2568_v32  ;;  %2435 = vmatprep.subr.bf16.mxu0 %v2569_v33 }
 0x12d   :  { %v2319_v49 = vpop.f32.mrf.mxu0 }
 0x12e   :  { %v2341_v50 = vpop.f32.mrf.mxu1 }
 0x12f   :  { %v2320_v51 = vpop.f32.mrf.mxu0 }
 0x130   :  { %v2342_v52 = vpop.f32.mrf.mxu1  ;;  %v2321_v57 = vadd.f32 %v2320_v51, %v2319_v49  ;;  %v2573_v51 = vld [vmem:[#allocation11 + $0x68] sm:$0xff]  }
 0x131   :  { %v2322_v53 = vpop.f32.mrf.mxu0  ;;  %v2343_v60 = vadd.f32 %v2342_v52, %v2341_v50  ;;  %v2574_v52 = vld [vmem:[#allocation11 + $0x28] sm:$0xff]  }
 0x132   :  { %v2344_v54 = vpop.f32.mrf.mxu1  ;;  %v727_v59 = vadd.f32 %v2321_v57, %v2120_v58  ;;  %v2575_v53 = vld [vmem:[#allocation11 + $0x60] sm:$0xff]   ;;  %v2579_v57 = vld [vmem:[#allocation11 + $0x50] sm:$0xff]  }
 0x133   :  { %v2323_v55 = vpop.f32.mrf.mxu0  ;;  %v2576_v54 = vld [vmem:[#allocation11 + $0x20] sm:$0xff]   ;;  %v2580_v58 = vld [vmem:[#allocation11 + $0x10] sm:$0xff]  }
 0x134   :  { %v2345_v56 = vpop.f32.mrf.mxu1  ;;  %v767_v0 = vadd.f32 %v2343_v60, %v727_v59  ;;  %v2577_v55 = vld [vmem:[#allocation11 + $0x58] sm:$0xff]   ;;  %v2581_v59 = vld [vmem:[#allocation11 + $0x48] sm:$0xff]  }
 0x135   :  { %v2578_v56 = vld [vmem:[#allocation11 + $0x18] sm:$0xff]   ;;  %v2582_v60 = vld [vmem:[#allocation11 + $0x8] sm:$0xff]  }
 0x14d   :  { %v2363_v61 = vpop.f32.mrf.mxu0 }
 0x14e   :  { %v2385_v62 = vpop.f32.mrf.mxu1 }
 0x14f   :  { %v2364_v63 = vpop.f32.mrf.mxu0 }
 0x150   :  { %v2365_v1 = vadd.f32 %v2364_v63, %v2363_v61  ;;  %v2386_v2 = vpop.f32.mrf.mxu1  ;;  %v2583_v61 = vld [vmem:[#allocation11 + $0x40] sm:$0xff]  }
 0x151   :  { %v2366_v3 = vpop.f32.mrf.mxu0  ;;  %v2387_v5 = vadd.f32 %v2386_v2, %v2385_v62  ;;  %v2584_v62 = vld [vmem:[#allocation11] sm:$0xff]  }
 0x152   :  { %v807_v4 = vadd.f32 %v2365_v1, %v767_v0  ;;  %v2388_v6 = vpop.f32.mrf.mxu1  ;;  %v1522_v63 = vld [vmem:[#allocation12 + $0x1c0] sm:$0xff]  ;;  %v1523_v1 = vld [vmem:[#allocation12 + $0x1c8] sm:$0xff] }
 0x153   :  { %v2367_v7 = vpop.f32.mrf.mxu0  ;;  %v1526_v0 = vld [vmem:[#allocation12 + $0x1e0] sm:$0xff] }
 0x154   :  { %v847_v8 = vadd.f32 %v2387_v5, %v807_v4  ;;  %v2389_v9 = vpop.f32.mrf.mxu1  ;;  %v2295_v2 = vcombine.low %v1522_v63, %v1526_v0  ;;  %v2296_v3 = vcombine.high %v1522_v63, %v1526_v0  ;;  %v1527_v4 = vld [vmem:[#allocation12 + $0x1e8] sm:$0xff]  ;;  %v1514_v5 = vld [vmem:[#allocation12 + $0x180] sm:$0xff] }
 0x155   :  { %v1518_v6 = vld [vmem:[#allocation12 + $0x1a0] sm:$0xff]  ;;  %v2297_v7 = vcombine.low %v1523_v1, %v1527_v4  ;;  %v1475_v0 = vld [vmem:[#allocation12 + $0x48] sm:$0xff] }
 0x156   :  { %v852_v10 = vmax.f32 %v847_v8, 0.0  ;;  %v2298_v8 = vcombine.high %v1523_v1, %v1527_v4  ;;  %v2288_v9 = vcombine.high %v1514_v5, %v1518_v6  ;;  %1892 = vmatprep.subr.bf16.mxu1 %v2296_v3  ;;  %v1478_v63 = vld [vmem:[#allocation12 + $0x60] sm:$0xff] }
 0x158   :  { %v853_v11 = vpack.c.bf16 %v852_v10, %v852_v10  ;;  %v2287_v10 = vcombine.low %v1514_v5, %v1518_v6  ;;  %v1466_v6 = vld [vmem:[#allocation12] sm:$0xff] }
 0x15a   :  { %854 = vst [vmem:[#allocation2] sm:$0x1] %v853_v11  ;;  %v1506_v11 = vld [vmem:[#allocation12 + $0x140] sm:$0xff] }
 0x15b   :  { %v2280_v13 = vcombine.high %v1506_v11, %v1510_v12  ;;  %v2279_v14 = vcombine.low %v1506_v11, %v1510_v12 }
 0x161   :  { %v2186_v15 = vld.sshfl [vmem:[#allocation2] sm:$0x11 pattern:$0x75316420] }
 0x162   :  { %v903_v17 = vcombine.high %v2186_v15, %v2186_v15  ;;  %v910_v19 = vrot.slane %v2186_v15, %v2850_v16  ;;  %v1498_v15 = vld [vmem:[#allocation12 + $0x100] sm:$0xff] }
 0x164   :  { %v917_v18 = vrot.slane %v903_v17, %v2850_v16  ;;  %v1502_v17 = vld [vmem:[#allocation12 + $0x120] sm:$0xff] }
 0x166   :  { %1048 = vmatprep.mubr.bf16.mxu0 %v917_v18  ;;  %v2272_v18 = vcombine.high %v1498_v15, %v1502_v17 }
 0x167   :  { %1049 = vmatmul.mubr.bf16.vlgmr.msra.gmra.mxu0 %v910_v19  ;;  %v2271_v19 = vcombine.low %v1498_v15, %v1502_v17  ;;  %v1528_v15 = vld [vmem:[#allocation12 + $0x1f0] sm:$0xff]  ;;  %v1525_v17 = vld [vmem:[#allocation12 + $0x1d8] sm:$0xff] }
 0x168   :  { %2436 = vmatpush3.bf16.msra.mxu0 %v2570_v34 }
 0x169   :  { %2437 = vmatprep.subr.bf16.mxu0 %v2571_v36 }
 0x16c   :  { %2438 = vmatpush3.bf16.msra.mxu0 %v2572_v37 }
 0x16d   :  { %2439 = vmatprep.subr.bf16.mxu0 %v2573_v51  ;;  %v1503_v51 = vld [vmem:[#allocation12 + $0x128] sm:$0xff] }
 0x170   :  { %2440 = vmatpush3.bf16.msra.mxu0 %v2574_v52 }
 0x171   :  { %2441 = vmatprep.subr.bf16.mxu0 %v2575_v53 }
 0x174   :  { %2442 = vmatpush3.bf16.msra.mxu0 %v2576_v54  ;;  %v1491_v54 = vld [vmem:[#allocation12 + $0xc8] sm:$0xff] }
 0x175   :  { %2443 = vmatprep.subr.bf16.mxu0 %v2577_v55  ;;  %v1495_v55 = vld [vmem:[#allocation12 + $0xe8] sm:$0xff] }
 0x178   :  { %2444 = vmatpush3.bf16.msra.mxu0 %v2578_v56 }
 0x179   :  { %2445 = vmatprep.subr.bf16.mxu0 %v2579_v57  ;;  %v1483_v57 = vld [vmem:[#allocation12 + $0x88] sm:$0xff] }
 0x17c   :  { %2446 = vmatpush3.bf16.msra.mxu0 %v2580_v58  ;;  %v1487_v58 = vld [vmem:[#allocation12 + $0xa8] sm:$0xff] }
 0x17d   :  { %2447 = vmatprep.subr.bf16.mxu0 %v2581_v59  ;;  %v2265_v59 = vcombine.low %v1491_v54, %v1495_v55 }
 0x180   :  { %2448 = vmatpush3.bf16.msra.mxu0 %v2582_v60  ;;  %v2258_v60 = vcombine.high %v1483_v57, %v1487_v58 }
 0x181   :  { %2449 = vmatprep.subr.bf16.mxu0 %v2583_v61  ;;  %v2257_v61 = vcombine.low %v1483_v57, %v1487_v58  ;;  %v1496_v57 = vld [vmem:[#allocation12 + $0xf0] sm:$0xff]  ;;  %v1493_v58 = vld [vmem:[#allocation12 + $0xd8] sm:$0xff] }
 0x184   :  { %2450 = vmatpush3.bf16.msra.mxu0 %v2584_v62  ;;  %v1474_v62 = vld [vmem:[#allocation12 + $0x40] sm:$0xff] }
 0x185   :  { %1933 = vmatprep.subr.bf16.mxu0 %v2298_v8  ;;  %v2248_v1 = vcombine.high %v1474_v62, %v1478_v63  ;;  %v2247_v3 = vcombine.low %v1474_v62, %v1478_v63  ;;  %v1467_v8 = vld [vmem:[#allocation12 + $0x8] sm:$0xff] }
 0x227   :  { %v2407_v38 = vpop.f32.mrf.mxu0 }
 0x229   :  { %v2408_v40 = vpop.f32.mrf.mxu0 }
 0x22a   :  { %v2409_v41 = vadd.f32 %v2408_v40, %v2407_v38 }
 0x22b   :  { %v2410_v42 = vpop.f32.mrf.mxu0 }
 0x22c   :  { %v1051_v43 = vadd.f32 %v2409_v41, %v2185_v39  ;;  %v1515_v41 = vld [vmem:[#allocation12 + $0x188] sm:$0xff] }
 0x22d   :  { %v2411_v44 = vpop.f32.mrf.mxu0  ;;  %v1519_v42 = vld [vmem:[#allocation12 + $0x1a8] sm:$0xff] }
 0x22e   :  { %v1056_v45 = vmax.f32 %v1051_v43, 0.0 }
 0x230   :  { %v1057_v46 = vpack.c.bf16 %v1056_v45, %v1056_v45  ;;  %v2290_v45 = vcombine.high %v1515_v41, %v1519_v42 }
 0x232   :  { %1058 = vst [vmem:[#allocation2] sm:$0x1] %v1057_v46  ;;  %v1507_v46 = vld [vmem:[#allocation12 + $0x148] sm:$0xff] }
 0x239   :  { %v2204_v47 = vld.sshfl [vmem:[#allocation2] sm:$0x11 pattern:$0x75316420] }
 0x23a   :  { %v1107_v48 = vcombine.high %v2204_v47, %v2204_v47  ;;  %v1114_v50 = vrot.slane %v2204_v47, %v2850_v16  ;;  %v1511_v47 = vld [vmem:[#allocation12 + $0x168] sm:$0xff] }
 0x23b   :  { %v2281_v52 = vcombine.low %v1507_v46, %v1511_v47 }
 0x23c   :  { %v1121_v49 = vrot.slane %v1107_v48, %v2850_v16  ;;  %v2289_v48 = vcombine.low %v1515_v41, %v1519_v42  ;;  %v1508_v41 = vld [vmem:[#allocation12 + $0x150] sm:$0xff] }
 0x23d   :  { %v1512_v42 = vld [vmem:[#allocation12 + $0x170] sm:$0xff] }
 0x23e   :  { %1252 = vmatprep.mubr.bf16.mxu1 %v1121_v49  ;;  %v2282_v49 = vcombine.high %v1507_v46, %v1511_v47  ;;  %v2284_v47 = vcombine.high %v1508_v41, %v1512_v42 }
 0x23f   :  { %1253 = vmatmul.mubr.bf16.vlgmr.msra.gmra.mxu1 %v1114_v50  ;;  %v1499_v50 = vld [vmem:[#allocation12 + $0x108] sm:$0xff] }
 0x240   :  { %1893 = vmatpush1.bf16.msra.mxu1 %v2295_v2  ;;  %v2274_v53 = vcombine.high %v1499_v50, %v1503_v51  ;;  %v2273_v56 = vcombine.low %v1499_v50, %v1503_v51  ;;  %v1479_v2 = vld [vmem:[#allocation12 + $0x68] sm:$0xff]  ;;  %v1504_v50 = vld [vmem:[#allocation12 + $0x130] sm:$0xff]  ;;  %v1501_v51 = vld [vmem:[#allocation12 + $0x118] sm:$0xff] }
 0x241   :  { %1894 = vmatprep.subr.bf16.mxu1 %v2288_v9  ;;  %v2249_v4 = vcombine.low %v1475_v0, %v1479_v2  ;;  %v2250_v5 = vcombine.high %v1475_v0, %v1479_v2  ;;  %v1484_v0 = vld [vmem:[#allocation12 + $0x90] sm:$0xff]  ;;  %v1485_v2 = vld [vmem:[#allocation12 + $0x98] sm:$0xff] }
 0x244   :  { %1895 = vmatpush1.bf16.msra.mxu1 %v2287_v10  ;;  %v1471_v10 = vld [vmem:[#allocation12 + $0x28] sm:$0xff] }
 0x245   :  { %1896 = vmatprep.subr.bf16.mxu1 %v2280_v13  ;;  %v2241_v12 = vcombine.low %v1467_v8, %v1471_v10  ;;  %v2242_v13 = vcombine.high %v1467_v8, %v1471_v10  ;;  %v1476_v8 = vld [vmem:[#allocation12 + $0x50] sm:$0xff]  ;;  %v1477_v10 = vld [vmem:[#allocation12 + $0x58] sm:$0xff] }
 0x248   :  { %1897 = vmatpush1.bf16.msra.mxu1 %v2279_v14  ;;  %v1524_v14 = vld [vmem:[#allocation12 + $0x1d0] sm:$0xff] }
 0x249   :  { %1898 = vmatprep.subr.bf16.mxu1 %v2272_v18  ;;  %v2747_v18 = vmov 0   ;;  %v2300_v20 = vcombine.high %v1524_v14, %v1528_v15 }
 0x24a   :  { %1924 = vmatprep.mubr.bf16.mxu1 %v2747_v18 }
 0x24c   :  { %1899 = vmatpush1.bf16.msra.mxu1 %v2271_v19  ;;  %v2299_v19 = vcombine.low %v1524_v14, %v1528_v15 }
 0x24d   :  { %1900 = vmatprep.subr.bf16.mxu1 %v2264_v22  ;;  %v2301_v22 = vcombine.low %v1525_v17, %v1529_v21 }
 0x250   :  { %1901 = vmatpush1.bf16.msra.mxu1 %v2263_v23  ;;  %v2302_v23 = vcombine.high %v1525_v17, %v1529_v21  ;;  %v1468_v17 = vld [vmem:[#allocation12 + $0x10] sm:$0xff] }
 0x251   :  { %1902 = vmatprep.subr.bf16.mxu1 %v2256_v26 }
 0x254   :  { %1903 = vmatpush1.bf16.msra.mxu1 %v2255_v27 }
 0x255   :  { %1904 = vmatprep.subr.bf16.mxu1 %v2248_v1  ;;  %v1488_v1 = vld [vmem:[#allocation12 + $0xb0] sm:$0xff] }
 0x258   :  { %1905 = vmatpush1.bf16.msra.mxu1 %v2247_v3  ;;  %v1489_v3 = vld [vmem:[#allocation12 + $0xb8] sm:$0xff] }
 0x2ff   :  { %v2429_v28 = vpop.f32.mrf.mxu1 }
 0x301   :  { %v2430_v31 = vpop.f32.mrf.mxu1 }
 0x302   :  { %v2431_v32 = vadd.f32 %v2430_v31, %v2429_v28  ;;  %v1516_v31 = vld [vmem:[#allocation12 + $0x190] sm:$0xff] }
 0x303   :  { %v2432_v33 = vpop.f32.mrf.mxu1 }
 0x304   :  { %v1255_v34 = vadd.f32 %v2431_v32, %v2203_v29  ;;  %v1520_v33 = vld [vmem:[#allocation12 + $0x1b0] sm:$0xff] }
 0x305   :  { %v2433_v36 = vpop.f32.mrf.mxu1 }
 0x306   :  { %v1260_v37 = vmax.f32 %v1255_v34, 0.0  ;;  %v1517_v34 = vld [vmem:[#allocation12 + $0x198] sm:$0xff] }
 0x307   :  { %v1521_v36 = vld [vmem:[#allocation12 + $0x1b8] sm:$0xff] }
 0x308   :  { %v1261_v38 = vpack.c.bf16 %v1260_v37, %v1260_v37  ;;  %v2293_v46 = vcombine.low %v1517_v34, %v1521_v36 }
 0x30a   :  { %1262 = vst [vmem:[#allocation2] sm:$0x1] %v1261_v38 }
 0x311   :  { %v2222_v39 = vld.sshfl [vmem:[#allocation2] sm:$0x11 pattern:$0x75316420] }
 0x312   :  { %v1311_v40 = vcombine.high %v2222_v39, %v2222_v39  ;;  %v1318_v44 = vrot.slane %v2222_v39, %v2850_v16  ;;  %v2292_v39 = vcombine.high %v1516_v31, %v1520_v33 }
 0x314   :  { %v1325_v43 = vrot.slane %v1311_v40, %v2850_v16  ;;  %v2266_v16 = vcombine.high %v1491_v54, %v1495_v55  ;;  %v2294_v40 = vcombine.high %v1517_v34, %v1521_v36 }
 0x316   :  { %1456 = vmatprep.mubr.bf16.mxu0 %v1325_v43  ;;  %v1509_v43 = vld [vmem:[#allocation12 + $0x158] sm:$0xff] }
 0x317   :  { %1457 = vmatmul.mubr.bf16.vlgmr.msra.gmra.mxu0 %v1318_v44  ;;  %v1513_v44 = vld [vmem:[#allocation12 + $0x178] sm:$0xff] }
 0x318   :  { %1934 = vmatpush1.bf16.msra.mxu0 %v2297_v7  ;;  %v1470_v7 = vld [vmem:[#allocation12 + $0x20] sm:$0xff]  ;;  %1965 = vmatprep.mubr.bf16.mxu0 %v2747_v18  ;;  %v2285_v54 = vcombine.low %v1509_v43, %v1513_v44 }
 0x319   :  { %1935 = vmatprep.subr.bf16.mxu0 %v2290_v45  ;;  %v2240_v9 = vcombine.high %v1466_v6, %v1470_v7  ;;  %v2239_v11 = vcombine.low %v1466_v6, %v1470_v7  ;;  %v2291_v45 = vcombine.low %v1516_v31, %v1520_v33  ;;  %v2260_v6 = vcombine.high %v1484_v0, %v1488_v1 }
 0x31a   :  { %v2262_v7 = vcombine.high %v1485_v2, %v1489_v3  ;;  %v1546_v31 = vsub.s32 3, %v2834_v30 }
 0x31b   :  { %1906 = vmatprep.subr.bf16.mxu1 %v2240_v9  ;;  %v1480_v9 = vld [vmem:[#allocation12 + $0x70] sm:$0xff] }
 0x31c   :  { %1936 = vmatpush1.bf16.msra.mxu0 %v2289_v48  ;;  %1907 = vmatpush1.bf16.msra.mxu1 %v2239_v11  ;;  %v2286_v48 = vcombine.high %v1509_v43, %v1513_v44  ;;  %v1481_v11 = vld [vmem:[#allocation12 + $0x78] sm:$0xff]  ;;  %v2252_v14 = vcombine.high %v1476_v8, %v1480_v9  ;;  %v2251_v21 = vcombine.low %v1476_v8, %v1480_v9 }
 0x31d   :  { %1937 = vmatprep.subr.bf16.mxu0 %v2282_v49  ;;  %1974 = vmatprep.subr.bf16.mxu1 %v2300_v20  ;;  %v1500_v49 = vld [vmem:[#allocation12 + $0x110] sm:$0xff]  ;;  %v2254_v15 = vcombine.high %v1477_v10, %v1481_v11  ;;  %v1473_v20 = vld [vmem:[#allocation12 + $0x38] sm:$0xff] }
 0x31e   :  { %v2276_v55 = vcombine.high %v1500_v49, %v1504_v50 }
 0x320   :  { %1938 = vmatpush1.bf16.msra.mxu0 %v2281_v52  ;;  %v1505_v52 = vld [vmem:[#allocation12 + $0x138] sm:$0xff] }
 0x321   :  { %1939 = vmatprep.subr.bf16.mxu0 %v2274_v53  ;;  %v2283_v53 = vcombine.low %v1508_v41, %v1512_v42 }
 0x324   :  { %1940 = vmatpush1.bf16.msra.mxu0 %v2273_v56  ;;  %v2278_v56 = vcombine.high %v1501_v51, %v1505_v52 }
 0x325   :  { %1941 = vmatprep.subr.bf16.mxu0 %v2266_v16  ;;  %v1492_v16 = vld [vmem:[#allocation12 + $0xd0] sm:$0xff] }
 0x326   :  { %v2268_v62 = vcombine.high %v1492_v16, %v1496_v57 }
 0x328   :  { %1942 = vmatpush1.bf16.msra.mxu0 %v2265_v59  ;;  %v1497_v59 = vld [vmem:[#allocation12 + $0xf8] sm:$0xff] }
 0x329   :  { %1943 = vmatprep.subr.bf16.mxu0 %v2258_v60  ;;  %v2275_v60 = vcombine.low %v1500_v49, %v1504_v50  ;;  %v2270_v63 = vcombine.high %v1493_v58, %v1497_v59 }
 0x32c   :  { %1944 = vmatpush1.bf16.msra.mxu0 %v2257_v61  ;;  %v2277_v61 = vcombine.low %v1501_v51, %v1505_v52 }
 0x32d   :  { %1945 = vmatprep.subr.bf16.mxu0 %v2250_v5  ;;  %v2269_v5 = vcombine.low %v1493_v58, %v1497_v59 }
 0x330   :  { %1946 = vmatpush1.bf16.msra.mxu0 %v2249_v4  ;;  %v2267_v4 = vcombine.low %v1492_v16, %v1496_v57  ;;  %v1554_v16 = vsub.s32 5, %v2834_v30  ;;  %v1562_v57 = vsub.s32 7, %v2834_v30 }
 0x331   :  { %1947 = vmatprep.subr.bf16.mxu0 %v2242_v13  ;;  %v2261_v13 = vcombine.low %v1485_v2, %v1489_v3 }
 0x334   :  { %1948 = vmatpush1.bf16.msra.mxu0 %v2241_v12  ;;  %v2259_v12 = vcombine.low %v1484_v0, %v1488_v1 }
 0x335   :  { %2015 = vmatprep.subr.bf16.mxu0 %v2302_v23 }
 0x3d7   :  { %v2451_v24 = vpop.f32.mrf.mxu0 }
 0x3d9   :  { %v2452_v26 = vpop.f32.mrf.mxu0 }
 0x3da   :  { %v2453_v27 = vadd.f32 %v2452_v26, %v2451_v24 }
 0x3db   :  { %v2454_v28 = vpop.f32.mrf.mxu0 }
 0x3dc   :  { %v1459_v29 = vadd.f32 %v2453_v27, %v2221_v25  ;;  %v1534_v27 = vsub.s32 0, %v2834_v30  ;;  %v1542_v28 = vsub.s32 2, %v2834_v30 }
 0x3dd   :  { %v2455_v32 = vpop.f32.mrf.mxu0 }
 0x3de   :  { %v1464_v37 = vmax.f32 %v1459_v29, 0.0  ;;  %v1538_v29 = vsub.s32 1, %v2834_v30  ;;  %v1530_v32 = vld [vmem:[%s2900_s9] sm:$0xff]  ;;  %s2748_s9 = smov [#allocation14]  }
 0x3df   :  { %v1535_v33 = vrot.slane %v1530_v32, %v1534_v27  ;;  %v1543_v34 = vrot.slane %v1530_v32, %v1542_v28  ;;  %s2108_s29 = sshll.u32 %s2748_s9, 4  ;;  %s2109_s29 = int_to_ptr.vmem [resolvable:$true] %s2108_s29 }
 0x3e0   :  { %v2867_v38 = vpack.c.bf16 %v1464_v37, %v1464_v37  ;;  %v1539_v36 = vrot.slane %v1530_v32, %v1538_v29  ;;  %v1547_v37 = vrot.slane %v1530_v32, %v1546_v31  ;;  %s2705_s30 = scalar_lea.vmem %s2109_s29, 256  ;;  %p2710_p3 = scmp.lt.s32.totalorder %s2109_s29, %s2109_s29 }
 0x3e1   :  { %p2706_p2 = scmp.ne.s32.totalorder %s2109_s29, %s2705_s30  ;;  %p2711_p4 = scmp.lt.s32.totalorder %s2705_s30, %s2705_s30 }
 0x3e2   :  { %1925 = vmatmul.mubr.bf16.vlgmr.msra.gmra.mxu1 %v2867_v38  ;;  %1966 = vmatmul.mubr.bf16.vlgmr.msra.gmra.mxu0 %v2867_v38 }
 0x3e3   :  { %1975 = vmatpush1.bf16.msra.mxu1 %v2299_v19  ;;  %2016 = vmatpush1.bf16.msra.mxu0 %v2301_v22  ;;  %v1469_v19 = vld [vmem:[#allocation12 + $0x18] sm:$0xff]  ;;  %v2253_v22 = vcombine.low %v1477_v10, %v1481_v11  ;;  %p2712_p5 = por %p2711_p4, %p2710_p3 }
 0x3e4   :  { %1976 = vmatprep.subr.bf16.mxu1 %v2292_v39  ;;  %2017 = vmatprep.subr.bf16.mxu0 %v2294_v40  ;;  %v2246_v24 = vcombine.high %v1469_v19, %v1473_v20  ;;  %v2245_v26 = vcombine.low %v1469_v19, %v1473_v20 }
 0x3e5   :  { %2006 = vmatprep.mubr.bf16.mxu1 %v2747_v18  ;;  %2047 = vmatprep.mubr.bf16.mxu0 %v2747_v18  ;;  %v1472_v18 = vld [vmem:[#allocation12 + $0x30] sm:$0xff]  ;;  %p2713_p6 = pnand %p2712_p5, %p2706_p2 }
 0x3e6   :  { %v2244_v23 = vcombine.high %v1468_v17, %v1472_v18  ;;  %v2243_v25 = vcombine.low %v1468_v17, %v1472_v18 }
 0x3e7   :  { %1977 = vmatpush1.bf16.msra.mxu1 %v2291_v45  ;;  %2018 = vmatpush1.bf16.msra.mxu0 %v2293_v46 }
 0x3e8   :  { %1978 = vmatprep.subr.bf16.mxu1 %v2284_v47  ;;  %2019 = vmatprep.subr.bf16.mxu0 %v2286_v48 }
 0x3eb   :  { %1979 = vmatpush1.bf16.msra.mxu1 %v2283_v53  ;;  %2020 = vmatpush1.bf16.msra.mxu0 %v2285_v54 }
 0x3ec   :  { %1980 = vmatprep.subr.bf16.mxu1 %v2276_v55  ;;  %2021 = vmatprep.subr.bf16.mxu0 %v2278_v56  ;;  %v1550_v55 = vsub.s32 4, %v2834_v30  ;;  %v1558_v56 = vsub.s32 6, %v2834_v30 }
 0x3ee   :  { %v1551_v58 = vrot.slane %v1530_v32, %v1550_v55  ;;  %v1559_v59 = vrot.slane %v1530_v32, %v1558_v56 }
 0x3ef   :  { %1981 = vmatpush1.bf16.msra.mxu1 %v2275_v60  ;;  %2022 = vmatpush1.bf16.msra.mxu0 %v2277_v61  ;;  %v1555_v60 = vrot.slane %v1530_v32, %v1554_v16  ;;  %v1563_v61 = vrot.slane %v1530_v32, %v1562_v57 }
 0x3f0   :  { %1982 = vmatprep.subr.bf16.mxu1 %v2268_v62  ;;  %2023 = vmatprep.subr.bf16.mxu0 %v2270_v63 }
 0x3f3   :  { %1983 = vmatpush1.bf16.msra.mxu1 %v2267_v4  ;;  %2024 = vmatpush1.bf16.msra.mxu0 %v2269_v5 }
 0x3f4   :  { %1984 = vmatprep.subr.bf16.mxu1 %v2260_v6  ;;  %2025 = vmatprep.subr.bf16.mxu0 %v2262_v7 }
 0x3f7   :  { %1985 = vmatpush1.bf16.msra.mxu1 %v2259_v12  ;;  %2026 = vmatpush1.bf16.msra.mxu0 %v2261_v13 }
 0x3f8   :  { %1986 = vmatprep.subr.bf16.mxu1 %v2252_v14  ;;  %2027 = vmatprep.subr.bf16.mxu0 %v2254_v15 }
 0x3fb   :  { %1987 = vmatpush1.bf16.msra.mxu1 %v2251_v21  ;;  %2028 = vmatpush1.bf16.msra.mxu0 %v2253_v22 }
 0x3fc   :  { %1988 = vmatprep.subr.bf16.mxu1 %v2244_v23  ;;  %2029 = vmatprep.subr.bf16.mxu0 %v2246_v24 }
 0x3ff   :  { %1989 = vmatpush1.bf16.msra.mxu1 %v2243_v25  ;;  %2030 = vmatpush1.bf16.msra.mxu0 %v2245_v26 }
 0x402   :  { %2007 = vmatmul.mubr.bf16.vlgmr.msra.gmra.mxu1 %v2867_v38  ;;  %2048 = vmatmul.mubr.bf16.vlgmr.msra.gmra.mxu0 %v2867_v38 }
 0x4a2   :  { %v1926_v39 = vpop.f32.mrf.mxu1  ;;  %v1967_v40 = vpop.f32.mrf.mxu0 }
 0x4a3   :  { %v1927_v42 = vadd.f32 %v1926_v39, %v1535_v33  ;;  %v1968_v43 = vadd.f32 %v1967_v40, %v1543_v34 }
 0x4a4   :  { %v1928_v41 = vpop.f32.mrf.mxu1  ;;  %v1969_v38 = vpop.f32.mrf.mxu0 }
 0x4a5   :  { %v1929_v44 = vadd.f32 %v1928_v41, %v1539_v36  ;;  %v1970_v45 = vadd.f32 %v1969_v38, %v1547_v37 }
 0x4a6   :  { %v1930_v46 = vpop.f32.mrf.mxu1  ;;  %v1971_v47 = vpop.f32.mrf.mxu0 }
 0x4a7   :  { %v2064_v48 = vcombine.low %v1927_v42, %v1929_v44  ;;  %v2065_v49 = vcombine.low %v1968_v43, %v1970_v45 }
 0x4a8   :  { %v1931_v50 = vpop.f32.mrf.mxu1  ;;  %v1972_v51 = vpop.f32.mrf.mxu0 }
 0x4a9   :  { %v2072_v52 = vrot.slane %v2064_v48, %v2837_v35  ;;  %v2079_v53 = vrot.slane %v2065_v49, %v2837_v35 }
 0x4ab   :  { %v2080_v54 = vcombine.low %v2072_v52, %v2079_v53 }
 0x4ad   :  { %2100 = vst [vmem:[#allocation14] sm:$0xff] %v2080_v54 }
 0x4c2   :  { %v2008_v62 = vpop.f32.mrf.mxu1  ;;  %v2049_v63 = vpop.f32.mrf.mxu0 }
 0x4c3   :  { %v2009_v2 = vadd.f32 %v2008_v62, %v1551_v58  ;;  %v2050_v3 = vadd.f32 %v2049_v63, %v1559_v59 }
 0x4c4   :  { %v2010_v0 = vpop.f32.mrf.mxu1  ;;  %v2051_v1 = vpop.f32.mrf.mxu0 }
 0x4c5   :  { %v2011_v4 = vadd.f32 %v2010_v0, %v1555_v60  ;;  %v2052_v5 = vadd.f32 %v2051_v1, %v1563_v61 }
 0x4c6   :  { %v2012_v6 = vpop.f32.mrf.mxu1  ;;  %v2053_v7 = vpop.f32.mrf.mxu0 }
 0x4c7   :  { %v2081_v8 = vcombine.low %v2009_v2, %v2011_v4  ;;  %v2082_v9 = vcombine.low %v2050_v3, %v2052_v5 }
 0x4c8   :  { %v2013_v10 = vpop.f32.mrf.mxu1  ;;  %v2054_v11 = vpop.f32.mrf.mxu0 }
 0x4c9   :  { %v2089_v30 = vrot.slane %v2081_v8, %v2837_v35  ;;  %v2096_v12 = vrot.slane %v2082_v9, %v2837_v35 }
 0x4cb   :  { %v2097_v13 = vcombine.low %v2089_v30, %v2096_v12 }
 0x4cd   :  { %2101 = vst [vmem:[#allocation14 + $0x8] sm:$0xff] %v2097_v13 }
 0x4ce   :  { %2716 = shalt.err (!%p2713_p6)
}
 0x4cf   :  { %2111 = dma.vmem_to_hbm [thread:$0]  %s2109_s29, 256, %s2901_s10, [#allocation5]  }
 0x4d0   :  { %2733 = dma.done.wait [#allocation5], 256  }
 0x4d1   :  { %2734 = vsyncadd [#allocation5], 4294967040 }
 0x4d2   :  { %2115 = vsyncpa [#allocation4], 1 }
 0x4d3   :  { %2116 = vsyncpa [#allocation7], 1 }
 0x4d4   :  { %2117 = vsyncpa [#allocation10], 1 }
 0x4d5   :  { %2118 = vsyncpa [#allocation13], 1 }
 0x4d6   :  { %2119 = vsyncpa [#allocation5], 1 }

</bundles_post_ra>
